<compile_context>
chip_gen: v6e
topology: v6e:2x2x1
jax: 0.10.0
libtpu: 0.0.40
codegen_flags: <defaults>
</compile_context>

<pallas_src>
import functools
import math

import jax
import jax.numpy as jnp
from jax.experimental import pallas as pl
from jax.experimental.pallas import tpu as pltpu

_HAS_BUFFERED = hasattr(pl, "Buffered")


def _round_up(x, m):
    return ((x + m - 1) // m) * m


def _cdiv(a, b):
    return -(-a // b)


def _sublane_align(dtype):
    """Min sublane multiple for dense (unmasked) packed tiles."""
    return max(8, 32 // jnp.dtype(dtype).itemsize)   # 8 f32, 16 bf16, 32 int8/fp8


def _vmem_capacity_bytes():
    try:
        return int(pltpu.get_tpu_info().vmem_capacity_bytes)
    except Exception:
        return 64 << 20   # conservative default: v7x per-TensorCore VMEM


# --------------------------------------------------------------------------- #
# Fully fused kernel: all layers in one pallas_call, activations stay in vregs #
# --------------------------------------------------------------------------- #
def _fused_mlp_kernel(*refs, num_layers, last_nl):
    """refs = (x_ref, w0_ref, b0_ref, w1_ref, b1_ref, ..., o_ref).

    Weights arrive pre-transposed & zero-padded as (K_pad, O_pad); biases as
    (1, O_pad) f32. Hidden activations are kept as values (never hit HBM).
    Matmul accumulates in f32; bias-add/ReLU stay f32 (cast to compute dtype
    only when feeding the next MXU op).
    """
    x_ref = refs[0]
    o_ref = refs[-1]
    h = x_ref[...]
    for l in range(num_layers):
        w = refs[1 + 2 * l][...]
        b = refs[2 + 2 * l][...]
        h = jnp.dot(h.astype(w.dtype), w, preferred_element_type=jnp.float32) + b
        if l < num_layers - 1:
            h = jnp.maximum(h, 0.0)                 # hidden layers: ReLU
        else:
            if last_nl == "relu":                   # output='normal'
                h = jnp.maximum(h, 0.0)
            elif last_nl == "sigmoid":              # output='sigmoid'
                h = jax.nn.sigmoid(h)
            # output='none': identity
    o_ref[...] = h.astype(o_ref.dtype)


# --------------------------------------------------------------------------- #
# Fallback: per-layer tiled matmul (used when weights don't fit VMEM-resident) #
# --------------------------------------------------------------------------- #
def _layer_matmul_kernel(x_ref, w_ref, b_ref, o_ref, acc_ref, *, nl):
    @pl.when(pl.program_id(2) == 0)
    def _():
        acc_ref[...] = jnp.zeros_like(acc_ref)
    acc_ref[...] += jnp.dot(x_ref[...], w_ref[...],
                            preferred_element_type=jnp.float32)

    @pl.when(pl.program_id(2) == pl.num_programs(2) - 1)
    def _():
        h = acc_ref[...] + b_ref[...]
        if nl == "relu":
            h = jnp.maximum(h, 0.0)
        elif nl == "sigmoid":
            h = jax.nn.sigmoid(h)
        o_ref[...] = h.astype(o_ref.dtype)


def _pick_tile(dim, cap, mult):
    """Largest multiple of `mult` that is <= cap and divides `dim`."""
    t = max((min(dim, cap) // mult) * mult, mult)
    while dim % t:
        t -= mult
    return t


def _layer_forward(h, wt, bp, nl, out_dtype, row_align):
    m, kp = h.shape
    _, op = wt.shape
    tm = _pick_tile(m, 512, row_align)
    tn = _pick_tile(op, 512, 128)
    tk = _pick_tile(kp, 1024, 128)
    kernel = functools.partial(_layer_matmul_kernel, nl=nl)
    return pl.pallas_call(
        kernel,
        out_shape=jax.ShapeDtypeStruct((m, op), out_dtype),
        grid=(m // tm, op // tn, kp // tk),
        in_specs=[pl.BlockSpec((tm, tk), lambda i, j, k: (i, k)),
                  pl.BlockSpec((tk, tn), lambda i, j, k: (k, j)),
                  pl.BlockSpec((1, tn), lambda i, j, k: (0, j))],
        out_specs=pl.BlockSpec((tm, tn), lambda i, j, k: (i, j)),
        scratch_shapes=[pltpu.VMEM((tm, tn), jnp.float32)],
        compiler_params=pltpu.CompilerParams(
            dimension_semantics=("parallel", "parallel", "arbitrary")),
    )(h, wt, bp)


# --------------------------------------------------------------------------- #
# Parameter init / layout prep                                                 #
# --------------------------------------------------------------------------- #
def init_mlp_params(key, size_per_layer):
    """Match PyTorch LinearExcitability.reset_parameters: U(-stdv, stdv), stdv=1/sqrt(in)."""
    params = []
    for lay in range(1, len(size_per_layer)):
        in_size, out_size = size_per_layer[lay - 1], size_per_layer[lay]
        key, kw, kb = jax.random.split(key, 3)
        stdv = 1.0 / math.sqrt(in_size)
        w = jax.random.uniform(kw, (out_size, in_size), jnp.float32, -stdv, stdv)
        b = jax.random.uniform(kb, (out_size,), jnp.float32, -stdv, stdv)
        params.append((w, b))
    return params


def prepare_mlp_params(params, compute_dtype=jnp.bfloat16):
    """One-time layout prep, hoisted out of the forward pass.

    Each (W:(O,K), b:(O,)) -> (W^T zero-padded to (K_pad,O_pad) in compute_dtype,
    b zero-padded to (1,O_pad) in f32). Zero padding keeps the math exact; padded
    output lanes stay zero through ReLU so chaining layers is still correct.
    compute_dtype=bfloat16 (default) gives full MXU rate on v6e/v7x; pass
    jnp.float32 for bit-exact-vs-f32 numerics.
    """
    padded = []
    feat_sizes = [params[0][0].shape[1]] + [w.shape[0] for (w, _) in params]
    for (w, b) in params:
        o, k = w.shape
        k_pad, o_pad = _round_up(k, 128), _round_up(o, 128)
        wt = jnp.pad(w.T.astype(compute_dtype), ((0, k_pad - k), (0, o_pad - o)))
        bp = jnp.pad(b.astype(jnp.float32), (0, o_pad - o)).reshape(1, o_pad)
        padded.append((wt, bp))
    return {"layers": padded, "feat_sizes": feat_sizes, "compute_dtype": compute_dtype}


# --------------------------------------------------------------------------- #
# Forward                                                                      #
# --------------------------------------------------------------------------- #
def mlp_forward(x, prepped, output="normal"):
    """MLP.forward. output in {'normal','none','sigmoid'} matches the module."""
    layers = prepped["layers"]
    feat_sizes = prepped["feat_sizes"]
    compute_dtype = prepped["compute_dtype"]
    num_layers = len(layers)
    if num_layers == 0:                       # MLP with layers < 1 is Identity
        return x

    n, k = x.shape
    assert k == feat_sizes[0]
    k0_pad = layers[0][0].shape[0]
    o_last = feat_sizes[-1]
    o_last_pad = layers[-1][0].shape[1]

    cbytes = jnp.dtype(compute_dtype).itemsize
    obytes = jnp.dtype(x.dtype).itemsize
    row_align = _sublane_align(compute_dtype)

    weight_bytes = sum(wt.size * wt.dtype.itemsize + bp.size * bp.dtype.itemsize
                       for wt, bp in layers)
    max_feat_pad = max(wt.shape[1] for wt, _ in layers)

    # Generation-aware VMEM budget (v5e/v6e: 128 MiB, v7x: 64 MiB) minus headroom.
    usable = max(_vmem_capacity_bytes() - (8 << 20), 32 << 20)

    # Per-batch-row VMEM cost with weights fully resident (single-buffered):
    # double-buffered streamed x/out blocks + live f32 activations (+ slack).
    per_row = 2 * k0_pad * cbytes + 2 * o_last_pad * obytes + 3 * max_feat_pad * 4
    remaining = usable - weight_bytes - (4 << 20)
    use_fused = remaining >= per_row * row_align

    if use_fused:
        # Batch tile: as big as the VMEM budget allows (per-step overhead bound
        # kernel), capped at 1024, aligned to the dtype's sublane packing, and
        # picked to minimize ragged padding.  Prefer >=2 grid steps so the
        # "parallel" axis can shard across v7x's 2 TensorCores.
        tm_max = min(1024, max(row_align,
                               (remaining // per_row) // row_align * row_align))
        min_steps = 2 if n >= 2 * row_align else 1
        n_steps = max(_cdiv(n, tm_max), min_steps)
        tm = min(_round_up(_cdiv(n, n_steps), row_align), tm_max)
        n_pad = _round_up(n, tm)
    else:
        tm = row_align
        n_pad = _round_up(n, row_align)

    # Skip the pad/cast entirely when it is a no-op (saves a full HBM round trip).
    if n_pad == n and k0_pad == k and x.dtype == compute_dtype:
        x_pad = x
    else:
        x_pad = jnp.pad(x.astype(compute_dtype), ((0, n_pad - n), (0, k0_pad - k)))

    last_nl = {"normal": "relu", "sigmoid": "sigmoid"}.get(output, "none")

    if use_fused:
        kernel = functools.partial(
            _fused_mlp_kernel, num_layers=num_layers, last_nl=last_nl)

        flat_inputs = [x_pad]
        flops = 0
        bytes_accessed = x_pad.size * x_pad.dtype.itemsize
        for (wt, bp) in layers:
            kp, op = wt.shape
            flat_inputs += [wt, bp]
            flops += 2 * n_pad * kp * op
            bytes_accessed += wt.size * wt.dtype.itemsize + bp.size * bp.dtype.itemsize
        bytes_accessed += n_pad * o_last_pad * obytes
        transcendentals = n_pad * o_last_pad if last_nl == "sigmoid" else 0

        def _run_fused(single_buffer):
            w_kwargs = {}
            if single_buffer and _HAS_BUFFERED:
                w_kwargs = dict(pipeline_mode=pl.Buffered(1))
            in_specs = [pl.BlockSpec((tm, k0_pad), lambda i: (i, 0))]
            for (wt, bp) in layers:
                kp, op = wt.shape
                # Grid-invariant blocks: single-buffered -> no wasted VMEM copy.
                in_specs.append(pl.BlockSpec((kp, op), lambda i: (0, 0), **w_kwargs))
                in_specs.append(pl.BlockSpec((1, op), lambda i: (0, 0), **w_kwargs))

            weight_resident = weight_bytes * (1 if (single_buffer and _HAS_BUFFERED) else 2)
            needed = (weight_resident
                      + 2 * tm * k0_pad * cbytes
                      + 2 * tm * o_last_pad * obytes
                      + 2 * tm * max_feat_pad * 4
                      + (4 << 20))
            vmem_limit = int(min(max(needed, 32 << 20), usable))

            return pl.pallas_call(
                kernel,
                out_shape=jax.ShapeDtypeStruct((n_pad, o_last_pad), x.dtype),
                grid=(n_pad // tm,),
                in_specs=in_specs,
                out_specs=pl.BlockSpec((tm, o_last_pad), lambda i: (i, 0)),
                compiler_params=pltpu.CompilerParams(
                    dimension_semantics=("parallel",),
                    vmem_limit_bytes=vmem_limit),
                cost_estimate=pl.CostEstimate(
                    flops=flops,
                    transcendentals=transcendentals,
                    bytes_accessed=bytes_accessed),
            )(*flat_inputs)

        if _HAS_BUFFERED:
            try:
                out_pad = _run_fused(True)
            except Exception:
                # Installed JAX rejected Buffered(1) -> standard double buffering.
                out_pad = _run_fused(False)
        else:
            out_pad = _run_fused(False)
    else:
        # Weights too large for full VMEM residency (e.g. very wide layers on
        # v7x): run each layer as a tiled matmul; hidden activations stream in
        # compute_dtype to halve HBM traffic.
        h = x_pad
        for l, (wt, bp) in enumerate(layers):
            is_last = l == num_layers - 1
            nl_l = last_nl if is_last else "relu"
            od = x.dtype if is_last else compute_dtype
            h = _layer_forward(h, wt, bp, nl_l, od, row_align)
        out_pad = h

    if n_pad == n and o_last_pad == o_last:
        return out_pad
    return out_pad[:n, :o_last]


# --------------------------------------------------------------------------- #
# Pure-JAX reference                                                           #
# --------------------------------------------------------------------------- #
def mlp_forward_ref(x, params, output="normal"):
    num_layers = len(params)
    for i, (w, b) in enumerate(params):
        x = x @ w.T + b
        if i < num_layers - 1 or output == "normal":
            x = jnp.maximum(x, 0.0)
        elif output == "sigmoid":
            x = jax.nn.sigmoid(x)
    return x


if __name__ == "__main__":
    # MLP(input_size=32, output_size=16, layers=2, hid_size=64)
    #   -> size_per_layer = [32, 64, 16], output='normal'
    size_per_layer = [32, 64, 16]

    key = jax.random.PRNGKey(0)
    key, kx = jax.random.split(key)
    params = init_mlp_params(key, size_per_layer)

    # --- f32 operands, batch=8 (single grid step, exact-vs-reference) ---
    x8 = jax.random.normal(kx, (8, size_per_layer[0]), jnp.float32)
    prepped_f32 = prepare_mlp_params(params, compute_dtype=jnp.float32)
    out8 = jax.block_until_ready(mlp_forward(x8, prepped_f32, output="normal"))
    ref8 = mlp_forward_ref(x8, params, output="normal")
    assert out8.shape == (8, size_per_layer[-1])
    assert jnp.allclose(out8, ref8, atol=1e-5, rtol=1e-5), "f32 mismatch vs reference"

    # --- f32 operands, ragged batch=100 (multi-step 'parallel' grid + pad/slice) ---
    key, kx2 = jax.random.split(key)
    x100 = jax.random.normal(kx2, (100, size_per_layer[0]), jnp.float32)
    out100 = jax.block_until_ready(mlp_forward(x100, prepped_f32, output="normal"))
    ref100 = mlp_forward_ref(x100, params, output="normal")
    assert out100.shape == (100, size_per_layer[-1])
    assert jnp.allclose(out100, ref100, atol=1e-5, rtol=1e-5), "ragged-batch mismatch"

    # --- bf16 operands (default; full MXU rate on v6e/v7x), f32 accumulation ---
    prepped_bf16 = prepare_mlp_params(params)   # compute_dtype=bfloat16 default
    out_bf = jax.block_until_ready(mlp_forward(x8, prepped_bf16, output="normal"))
    assert out_bf.shape == (8, size_per_layer[-1])
    assert jnp.allclose(out_bf, ref8, atol=5e-2, rtol=5e-2), "bf16 mismatch vs reference"

    print("KERNEL_OK")
</pallas_src>

<mosaic_0001>
module attributes {stable_mosaic.version = 11 : i64} {
  func.func @_fused_mlp_kernel(%arg0: i32, %arg1: memref<8x128xf32, #tpu.memory_space<vmem>>, %arg2: memref<128x128xf32, #tpu.memory_space<vmem>>, %arg3: memref<1x128xf32, #tpu.memory_space<vmem>>, %arg4: memref<128x128xf32, #tpu.memory_space<vmem>>, %arg5: memref<1x128xf32, #tpu.memory_space<vmem>>, %arg6: memref<8x128xf32, #tpu.memory_space<vmem>>) attributes {dimension_semantics = [#tpu.dimension_semantics<parallel>], iteration_bounds = array<i64: 1>, scalar_prefetch = 0 : i64, scratch_operands = 0 : i64, tpu.core_type = #tpu.core_type<tc>, window_params = [{transform_indices = @transform_0, window_bounds = array<i64: 8, 128>}, {pipeline_mode = #tpu.pipeline_mode<synchronous>, transform_indices = @transform_1, window_bounds = array<i64: 128, 128>}, {pipeline_mode = #tpu.pipeline_mode<synchronous>, transform_indices = @transform_2, window_bounds = array<i64: 1, 128>}, {pipeline_mode = #tpu.pipeline_mode<synchronous>, transform_indices = @transform_3, window_bounds = array<i64: 128, 128>}, {pipeline_mode = #tpu.pipeline_mode<synchronous>, transform_indices = @transform_4, window_bounds = array<i64: 1, 128>}, {transform_indices = @transform_5, window_bounds = array<i64: 8, 128>}]} {
    %c0 = arith.constant 0 : index
    %c0_0 = arith.constant 0 : index
    %0 = vector.load %arg1[%c0, %c0_0] : memref<8x128xf32, #tpu.memory_space<vmem>>, vector<8x128xf32>
    %c0_1 = arith.constant 0 : index
    %c0_2 = arith.constant 0 : index
    %1 = vector.load %arg2[%c0_1, %c0_2] : memref<128x128xf32, #tpu.memory_space<vmem>>, vector<128x128xf32>
    %c0_3 = arith.constant 0 : index
    %c0_4 = arith.constant 0 : index
    %2 = vector.load %arg3[%c0_3, %c0_4] : memref<1x128xf32, #tpu.memory_space<vmem>>, vector<1x128xf32>
    %cst = arith.constant dense<0.000000e+00> : vector<8x128xf32>
    %3 = tpu.matmul %0, %1, %cst {dimension_numbers = #tpu.dot_dimension_numbers<[1], [0], [0], [1], [0, 0, 1, 1], [], []>} : vector<8x128xf32>, vector<128x128xf32>, vector<8x128xf32> -> vector<8x128xf32>
    %4 = vector.broadcast %2 : vector<1x128xf32> to vector<8x128xf32>
    %5 = arith.addf %3, %4 : vector<8x128xf32>
    %cst_5 = arith.constant 0.000000e+00 : f32
    %6 = vector.broadcast %cst_5 : f32 to vector<8x128xf32>
    %7 = arith.maximumf %5, %6 : vector<8x128xf32>
    %c0_6 = arith.constant 0 : index
    %c0_7 = arith.constant 0 : index
    %8 = vector.load %arg4[%c0_6, %c0_7] : memref<128x128xf32, #tpu.memory_space<vmem>>, vector<128x128xf32>
    %c0_8 = arith.constant 0 : index
    %c0_9 = arith.constant 0 : index
    %9 = vector.load %arg5[%c0_8, %c0_9] : memref<1x128xf32, #tpu.memory_space<vmem>>, vector<1x128xf32>
    %cst_10 = arith.constant dense<0.000000e+00> : vector<8x128xf32>
    %10 = tpu.matmul %7, %8, %cst_10 {dimension_numbers = #tpu.dot_dimension_numbers<[1], [0], [0], [1], [0, 0, 1, 1], [], []>} : vector<8x128xf32>, vector<128x128xf32>, vector<8x128xf32> -> vector<8x128xf32>
    %11 = vector.broadcast %9 : vector<1x128xf32> to vector<8x128xf32>
    %12 = arith.addf %10, %11 : vector<8x128xf32>
    %cst_11 = arith.constant 0.000000e+00 : f32
    %13 = vector.broadcast %cst_11 : f32 to vector<8x128xf32>
    %14 = arith.maximumf %12, %13 : vector<8x128xf32>
    %c0_12 = arith.constant 0 : index
    %c0_13 = arith.constant 0 : index
    %15 = vector.load %arg6[%c0_12, %c0_13] : memref<8x128xf32, #tpu.memory_space<vmem>>, vector<8x128xf32>
    tpu.vector_store %arg6[%c0_12, %c0_13], %14 {strides = array<i32>} : memref<8x128xf32, #tpu.memory_space<vmem>>, vector<8x128xf32>,
    return
  }
  func.func @transform_0(%arg0: i32) -> (i32, i32) {
    %c0_i32 = arith.constant 0 : i32
    %c0_i32_0 = arith.constant 0 : i32
    return %arg0, %c0_i32 : i32, i32
  }
  func.func @transform_1(%arg0: i32) -> (i32, i32) {
    %c0_i32 = arith.constant 0 : i32
    %c0_i32_0 = arith.constant 0 : i32
    %c0_i32_1 = arith.constant 0 : i32
    return %c0_i32, %c0_i32_0 : i32, i32
  }
  func.func @transform_2(%arg0: i32) -> (i32, i32) {
    %c0_i32 = arith.constant 0 : i32
    %c0_i32_0 = arith.constant 0 : i32
    %c0_i32_1 = arith.constant 0 : i32
    return %c0_i32, %c0_i32_0 : i32, i32
  }
  func.func @transform_3(%arg0: i32) -> (i32, i32) {
    %c0_i32 = arith.constant 0 : i32
    %c0_i32_0 = arith.constant 0 : i32
    %c0_i32_1 = arith.constant 0 : i32
    return %c0_i32, %c0_i32_0 : i32, i32
  }
  func.func @transform_4(%arg0: i32) -> (i32, i32) {
    %c0_i32 = arith.constant 0 : i32
    %c0_i32_0 = arith.constant 0 : i32
    %c0_i32_1 = arith.constant 0 : i32
    return %c0_i32, %c0_i32_0 : i32, i32
  }
  func.func @transform_5(%arg0: i32) -> (i32, i32) {
    %c0_i32 = arith.constant 0 : i32
    %c0_i32_0 = arith.constant 0 : i32
    return %arg0, %c0_i32 : i32, i32
  }
}

module attributes {stable_mosaic.version = 11 : i64} {
  func.func @_fused_mlp_kernel(%arg0: i32, %arg1: memref<8x128xf32, #tpu.memory_space<vmem>>, %arg2: memref<128x128xf32, #tpu.memory_space<vmem>>, %arg3: memref<1x128xf32, #tpu.memory_space<vmem>>, %arg4: memref<128x128xf32, #tpu.memory_space<vmem>>, %arg5: memref<1x128xf32, #tpu.memory_space<vmem>>, %arg6: memref<8x128xf32, #tpu.memory_space<vmem>>) attributes {dimension_semantics = [#tpu.dimension_semantics<parallel>], iteration_bounds = array<i64: 1>, scalar_prefetch = 0 : i64, scratch_operands = 0 : i64, tpu.core_type = #tpu.core_type<tc>, window_params = [{transform_indices = @transform_0, window_bounds = array<i64: 8, 128>}, {pipeline_mode = #tpu.pipeline_mode<synchronous>, transform_indices = @transform_1, window_bounds = array<i64: 128, 128>}, {pipeline_mode = #tpu.pipeline_mode<synchronous>, transform_indices = @transform_2, window_bounds = array<i64: 1, 128>}, {pipeline_mode = #tpu.pipeline_mode<synchronous>, transform_indices = @transform_3, window_bounds = array<i64: 128, 128>}, {pipeline_mode = #tpu.pipeline_mode<synchronous>, transform_indices = @transform_4, window_bounds = array<i64: 1, 128>}, {transform_indices = @transform_5, window_bounds = array<i64: 8, 128>}]} {
    %c0 = arith.constant 0 : index
    %c0_0 = arith.constant 0 : index
    %0 = vector.load %arg1[%c0, %c0_0] : memref<8x128xf32, #tpu.memory_space<vmem>>, vector<8x128xf32>
    %c0_1 = arith.constant 0 : index
    %c0_2 = arith.constant 0 : index
    %1 = vector.load %arg2[%c0_1, %c0_2] : memref<128x128xf32, #tpu.memory_space<vmem>>, vector<128x128xf32>
    %c0_3 = arith.constant 0 : index
    %c0_4 = arith.constant 0 : index
    %2 = vector.load %arg3[%c0_3, %c0_4] : memref<1x128xf32, #tpu.memory_space<vmem>>, vector<1x128xf32>
    %cst = arith.constant dense<0.000000e+00> : vector<8x128xf32>
    %3 = tpu.matmul %0, %1, %cst {dimension_numbers = #tpu.dot_dimension_numbers<[1], [0], [0], [1], [0, 0, 1, 1], [], []>} : vector<8x128xf32>, vector<128x128xf32>, vector<8x128xf32> -> vector<8x128xf32>
    %4 = vector.broadcast %2 : vector<1x128xf32> to vector<8x128xf32>
    %5 = arith.addf %3, %4 : vector<8x128xf32>
    %cst_5 = arith.constant 0.000000e+00 : f32
    %6 = vector.broadcast %cst_5 : f32 to vector<8x128xf32>
    %7 = arith.maximumf %5, %6 : vector<8x128xf32>
    %c0_6 = arith.constant 0 : index
    %c0_7 = arith.constant 0 : index
    %8 = vector.load %arg4[%c0_6, %c0_7] : memref<128x128xf32, #tpu.memory_space<vmem>>, vector<128x128xf32>
    %c0_8 = arith.constant 0 : index
    %c0_9 = arith.constant 0 : index
    %9 = vector.load %arg5[%c0_8, %c0_9] : memref<1x128xf32, #tpu.memory_space<vmem>>, vector<1x128xf32>
    %cst_10 = arith.constant dense<0.000000e+00> : vector<8x128xf32>
    %10 = tpu.matmul %7, %8, %cst_10 {dimension_numbers = #tpu.dot_dimension_numbers<[1], [0], [0], [1], [0, 0, 1, 1], [], []>} : vector<8x128xf32>, vector<128x128xf32>, vector<8x128xf32> -> vector<8x128xf32>
    %11 = vector.broadcast %9 : vector<1x128xf32> to vector<8x128xf32>
    %12 = arith.addf %10, %11 : vector<8x128xf32>
    %cst_11 = arith.constant 0.000000e+00 : f32
    %13 = vector.broadcast %cst_11 : f32 to vector<8x128xf32>
    %14 = arith.maximumf %12, %13 : vector<8x128xf32>
    %c0_12 = arith.constant 0 : index
    %c0_13 = arith.constant 0 : index
    %15 = vector.load %arg6[%c0_12, %c0_13] : memref<8x128xf32, #tpu.memory_space<vmem>>, vector<8x128xf32>
    tpu.vector_store %arg6[%c0_12, %c0_13], %14 {strides = array<i32>} : memref<8x128xf32, #tpu.memory_space<vmem>>, vector<8x128xf32>,
    return
  }
  func.func @transform_0(%arg0: i32) -> (i32, i32) {
    %c0_i32 = arith.constant 0 : i32
    %c0_i32_0 = arith.constant 0 : i32
    return %arg0, %c0_i32 : i32, i32
  }
  func.func @transform_1(%arg0: i32) -> (i32, i32) {
    %c0_i32 = arith.constant 0 : i32
    %c0_i32_0 = arith.constant 0 : i32
    %c0_i32_1 = arith.constant 0 : i32
    return %c0_i32, %c0_i32_0 : i32, i32
  }
  func.func @transform_2(%arg0: i32) -> (i32, i32) {
    %c0_i32 = arith.constant 0 : i32
    %c0_i32_0 = arith.constant 0 : i32
    %c0_i32_1 = arith.constant 0 : i32
    return %c0_i32, %c0_i32_0 : i32, i32
  }
  func.func @transform_3(%arg0: i32) -> (i32, i32) {
    %c0_i32 = arith.constant 0 : i32
    %c0_i32_0 = arith.constant 0 : i32
    %c0_i32_1 = arith.constant 0 : i32
    return %c0_i32, %c0_i32_0 : i32, i32
  }
  func.func @transform_4(%arg0: i32) -> (i32, i32) {
    %c0_i32 = arith.constant 0 : i32
    %c0_i32_0 = arith.constant 0 : i32
    %c0_i32_1 = arith.constant 0 : i32
    return %c0_i32, %c0_i32_0 : i32, i32
  }
  func.func @transform_5(%arg0: i32) -> (i32, i32) {
    %c0_i32 = arith.constant 0 : i32
    %c0_i32_0 = arith.constant 0 : i32
    return %arg0, %c0_i32 : i32, i32
  }
}

</mosaic_0001>

<bundles_post_ra>
// kernel: tpu_custom_call.1
= control target key start
LH: loop header
LB: loop body
LE: loop exit
PB: predicated region body
PF: predicated region fallthrough
CT: control target
= control target key end

     0   :  { %10 = vsyncpa [#allocation3], 0  ;;  %s556_s0 = inlined_call_operand.hbm [shape: f32[8,128], index: 0, kind: input, shape index: {}]   ;;  %s557_s1 = inlined_call_operand.hbm [shape: f32[128,128], index: 1, kind: input, shape index: {}]   ;;  %s558_s2 = inlined_call_operand.vmem [shape: f32[1,128], index: 2, kind: input, shape index: {}]   ;;  %s559_s3 = inlined_call_operand.hbm [shape: f32[128,128], index: 3, kind: input, shape index: {}]   ;;  %s560_s4 = inlined_call_operand.vmem [shape: f32[1,128], index: 4, kind: input, shape index: {}]   ;;  %s561_s5 = inlined_call_operand.hbm [shape: f32[8,128], index: 5, kind: output, shape index: {}]  }
   0x1   :  { %11 = vsyncpa [#allocation6], 0 }
   0x2   :  { %12 = vsyncpa [#allocation4], 0  ;;  %s466_s18 = smov [#allocation5]  }
   0x3   :  { %s28_s19 = sshll.u32 %s466_s18, 4  ;;  %s29_s19 = int_to_ptr.vmem [resolvable:$true] %s28_s19 }
   0x4   :  { %s388_s20 = scalar_lea.vmem %s29_s19, 2048  ;;  %p393_p1 = scmp.lt.s32.totalorder %s29_s19, %s29_s19 }
   0x5   :  { %p389_p0 = scmp.ne.s32.totalorder %s29_s19, %s388_s20  ;;  %p394_p2 = scmp.lt.s32.totalorder %s388_s20, %s388_s20 }
   0x7   :  { %p395_p3 = por %p394_p2, %p393_p1 }
   0x9   :  { %p396_p4 = pnand %p395_p3, %p389_p0 }
   0xb   :  { %399 = shalt.err (!%p396_p4)
}
   0xc   :  { %s467_s21 = smov 128   ;;  %s468_s22 = smov 8  }
   0xd   :  { %34 = dma.hbm_to_vmem [thread:$0]  %s557_s1, 2048, %s29_s19, [#allocation6], %s467_s21, %s467_s21, %s468_s22  }
   0xe   :  { %s469_s25 = smov [#allocation2]   ;;  %s470_s27 = smov [#allocation7]  }
   0xf   :  { %s19_s26 = sshll.u32 %s469_s25, 4  ;;  %s42_s28 = sshll.u32 %s470_s27, 4  ;;  %s20_s26 = int_to_ptr.vmem [resolvable:$true] %s19_s26  ;;  %s43_s28 = int_to_ptr.vmem [resolvable:$true] %s42_s28 }
  0x10   :  { %s408_s29 = scalar_lea.vmem %s20_s26, 128  ;;  %p413_p6 = scmp.lt.s32.totalorder %s20_s26, %s20_s26 }
  0x11   :  { %p409_p5 = scmp.ne.s32.totalorder %s20_s26, %s408_s29  ;;  %p414_p7 = scmp.lt.s32.totalorder %s408_s29, %s408_s29 }
  0x13   :  { %p415_p8 = por %p414_p7, %p413_p6 }
  0x15   :  { %p416_p9 = pnand %p415_p8, %p409_p5 }
  0x17   :  { %419 = shalt.err (!%p416_p9)
}
  0x18   :  { %22 = dma.hbm_to_vmem [thread:$0]  %s556_s0, 128, %s20_s26, [#allocation3]  }
  0x19   :  { %s428_s7 = scalar_lea.vmem %s43_s28, 2048  ;;  %p433_p11 = scmp.lt.s32.totalorder %s43_s28, %s43_s28 }
  0x1a   :  { %p429_p10 = scmp.ne.s32.totalorder %s43_s28, %s428_s7  ;;  %p434_p12 = scmp.lt.s32.totalorder %s428_s7, %s428_s7 }
  0x1c   :  { %p435_p13 = por %p434_p12, %p433_p11 }
  0x1e   :  { %p436_p0 = pnand %p435_p13, %p429_p10 }
  0x20   :  { %439 = shalt.err (!%p436_p0)
}
  0x21   :  { %48 = dma.hbm_to_vmem [thread:$0]  %s559_s3, 2048, %s43_s28, [#allocation6], %s467_s21, %s467_s21, %s468_s22  }
  0x22   :  { %460 = dma.done.wait [#allocation3], 128  }
  0x23   :  { %461 = vsyncadd [#allocation3], 4294967168 }
  0x24   :  { %462 = dma.done.wait [#allocation6], 4096  }
  0x25   :  { %463 = vsyncadd [#allocation6], 4294963200  ;;  %v471_v0 = vmov 0.0   ;;  %vm472_vm0 = vmmov 0   ;;  %v76_v1 = vld [vmem:[#allocation5 + $0x78] sm:$0xff]  ;;  %v75_v2 = vld [vmem:[#allocation5 + $0x70] sm:$0xff] }
  0x26   :  { %302 = vmatprep.subr.mxu0 %v471_v0  ;;  %334 = vmatprep.mubr.msk.f32.mxu0 %vm472_vm0, %v471_v0  ;;  %v74_v3 = vld [vmem:[#allocation5 + $0x68] sm:$0xff]  ;;  %v73_v4 = vld [vmem:[#allocation5 + $0x60] sm:$0xff]  ;;  %v170_v5 = vld [vmem:[#allocation7 + $0x78] sm:$0xff]  ;;  %s473_s11 = smov [#allocation8]  }
  0x27   :  { %337 = vmatprep.subr.mxu1 %v471_v0  ;;  %369 = vmatprep.mubr.msk.f32.mxu1 %vm472_vm0, %v471_v0  ;;  %v72_v6 = vld [vmem:[#allocation5 + $0x58] sm:$0xff]  ;;  %v169_v7 = vld [vmem:[#allocation7 + $0x70] sm:$0xff]  ;;  %v168_v8 = vld [vmem:[#allocation7 + $0x68] sm:$0xff]  ;;  %s256_s12 = sshll.u32 %s473_s11, 4  ;;  %s257_s12 = int_to_ptr.vmem [resolvable:$true] %s256_s12 }
  0x28   :  { %303 = vmatpush3.msra.mxu0 %v76_v1  ;;  %338 = vmatpush3.msra.mxu1 %v170_v5  ;;  %v71_v9 = vld [vmem:[#allocation5 + $0x50] sm:$0xff]  ;;  %v167_v10 = vld [vmem:[#allocation7 + $0x60] sm:$0xff]  ;;  %v70_v11 = vld [vmem:[#allocation5 + $0x48] sm:$0xff]  ;;  %s440_s13 = scalar_lea.vmem %s257_s12, 128  ;;  %p445_p2 = scmp.lt.s32.totalorder %s257_s12, %s257_s12 }
  0x29   :  { %304 = vmatprep.subr.mxu0 %v471_v0  ;;  %339 = vmatprep.subr.mxu1 %v471_v0  ;;  %v166_v12 = vld [vmem:[#allocation7 + $0x58] sm:$0xff]  ;;  %v69_v13 = vld [vmem:[#allocation5 + $0x40] sm:$0xff]  ;;  %v165_v14 = vld [vmem:[#allocation7 + $0x50] sm:$0xff]  ;;  %p441_p1 = scmp.ne.s32.totalorder %s257_s12, %s440_s13  ;;  %p446_p3 = scmp.lt.s32.totalorder %s440_s13, %s440_s13 }
  0x2a   :  { %305 = vmatpush3.msra.mxu0 %v75_v2  ;;  %340 = vmatpush3.msra.mxu1 %v169_v7  ;;  %v68_v15 = vld [vmem:[#allocation5 + $0x38] sm:$0xff]  ;;  %v164_v16 = vld [vmem:[#allocation7 + $0x48] sm:$0xff]  ;;  %v67_v17 = vld [vmem:[#allocation5 + $0x30] sm:$0xff] }
  0x2b   :  { %306 = vmatprep.subr.mxu0 %v471_v0  ;;  %341 = vmatprep.subr.mxu1 %v471_v0  ;;  %v163_v18 = vld [vmem:[#allocation7 + $0x40] sm:$0xff]  ;;  %v66_v19 = vld [vmem:[#allocation5 + $0x28] sm:$0xff]  ;;  %v162_v20 = vld [vmem:[#allocation7 + $0x38] sm:$0xff]  ;;  %p447_p4 = por %p446_p3, %p445_p2 }
  0x2c   :  { %307 = vmatpush3.msra.mxu0 %v74_v3  ;;  %342 = vmatpush3.msra.mxu1 %v168_v8  ;;  %v65_v21 = vld [vmem:[#allocation5 + $0x20] sm:$0xff]  ;;  %v161_v22 = vld [vmem:[#allocation7 + $0x30] sm:$0xff]  ;;  %v64_v23 = vld [vmem:[#allocation5 + $0x18] sm:$0xff] }
  0x2d   :  { %308 = vmatprep.subr.mxu0 %v471_v0  ;;  %343 = vmatprep.subr.mxu1 %v471_v0  ;;  %v160_v24 = vld [vmem:[#allocation7 + $0x28] sm:$0xff]  ;;  %v63_v25 = vld [vmem:[#allocation5 + $0x10] sm:$0xff]  ;;  %v159_v26 = vld [vmem:[#allocation7 + $0x20] sm:$0xff]  ;;  %p448_p5 = pnand %p447_p4, %p441_p1 }
  0x2e   :  { %309 = vmatpush3.msra.mxu0 %v73_v4  ;;  %344 = vmatpush3.msra.mxu1 %v167_v10  ;;  %v62_v27 = vld [vmem:[#allocation5 + $0x8] sm:$0xff]  ;;  %v158_v28 = vld [vmem:[#allocation7 + $0x18] sm:$0xff]  ;;  %v61_v29 = vld [vmem:[#allocation5] sm:$0xff] }
  0x2f   :  { %310 = vmatprep.subr.mxu0 %v471_v0  ;;  %345 = vmatprep.subr.mxu1 %v471_v0  ;;  %v60_v30 = vld [vmem:[#allocation2] sm:$0xff]  ;;  %v157_v31 = vld [vmem:[#allocation7 + $0x10] sm:$0xff]  ;;  %v156_v32 = vld [vmem:[#allocation7 + $0x8] sm:$0xff] }
  0x30   :  { %311 = vmatpush3.msra.mxu0 %v72_v6  ;;  %346 = vmatpush3.msra.mxu1 %v166_v12  ;;  %v155_v33 = vld [vmem:[#allocation7] sm:$0xff]  ;;  %v266_v34 = vld [vmem:[%s558_s2] ss:$0 sm:$0xff] }
  0x31   :  { %312 = vmatprep.subr.mxu0 %v471_v0  ;;  %347 = vmatprep.subr.mxu1 %v471_v0  ;;  %v267_v39 = vld [vmem:[%s560_s4] ss:$0 sm:$0xff] }
  0x32   :  { %313 = vmatpush3.msra.mxu0 %v71_v9  ;;  %348 = vmatpush3.msra.mxu1 %v165_v14 }
  0x33   :  { %314 = vmatprep.subr.mxu0 %v471_v0  ;;  %349 = vmatprep.subr.mxu1 %v471_v0 }
  0x34   :  { %315 = vmatpush3.msra.mxu0 %v70_v11  ;;  %350 = vmatpush3.msra.mxu1 %v164_v16 }
  0x35   :  { %316 = vmatprep.subr.mxu0 %v471_v0  ;;  %351 = vmatprep.subr.mxu1 %v471_v0 }
  0x36   :  { %317 = vmatpush3.msra.mxu0 %v69_v13  ;;  %352 = vmatpush3.msra.mxu1 %v163_v18 }
  0x37   :  { %318 = vmatprep.subr.mxu0 %v471_v0  ;;  %353 = vmatprep.subr.mxu1 %v471_v0 }
  0x38   :  { %319 = vmatpush3.msra.mxu0 %v68_v15  ;;  %354 = vmatpush3.msra.mxu1 %v162_v20 }
  0x39   :  { %320 = vmatprep.subr.mxu0 %v471_v0  ;;  %355 = vmatprep.subr.mxu1 %v471_v0 }
  0x3a   :  { %321 = vmatpush3.msra.mxu0 %v67_v17  ;;  %356 = vmatpush3.msra.mxu1 %v161_v22 }
  0x3b   :  { %322 = vmatprep.subr.mxu0 %v471_v0  ;;  %357 = vmatprep.subr.mxu1 %v471_v0 }
  0x3c   :  { %323 = vmatpush3.msra.mxu0 %v66_v19  ;;  %358 = vmatpush3.msra.mxu1 %v160_v24 }
  0x3d   :  { %324 = vmatprep.subr.mxu0 %v471_v0  ;;  %359 = vmatprep.subr.mxu1 %v471_v0 }
  0x3e   :  { %325 = vmatpush3.msra.mxu0 %v65_v21  ;;  %360 = vmatpush3.msra.mxu1 %v159_v26 }
  0x3f   :  { %326 = vmatprep.subr.mxu0 %v471_v0  ;;  %361 = vmatprep.subr.mxu1 %v471_v0 }
  0x40   :  { %327 = vmatpush3.msra.mxu0 %v64_v23  ;;  %362 = vmatpush3.msra.mxu1 %v158_v28 }
  0x41   :  { %328 = vmatprep.subr.mxu0 %v471_v0  ;;  %363 = vmatprep.subr.mxu1 %v471_v0 }
  0x42   :  { %329 = vmatpush3.msra.mxu0 %v63_v25  ;;  %364 = vmatpush3.msra.mxu1 %v157_v31 }
  0x43   :  { %330 = vmatprep.subr.mxu0 %v471_v0  ;;  %365 = vmatprep.subr.mxu1 %v471_v0 }
  0x44   :  { %331 = vmatpush3.msra.mxu0 %v62_v27  ;;  %366 = vmatpush3.msra.mxu1 %v156_v32 }
  0x45   :  { %332 = vmatprep.subr.mxu0 %v471_v0  ;;  %367 = vmatprep.subr.mxu1 %v471_v0 }
  0x46   :  { %333 = vmatpush3.msra.mxu0 %v61_v29  ;;  %368 = vmatpush3.msra.mxu1 %v155_v33 }
  0x47   :  { %335 = vmatmul.mubr.f32.vlgmr.msra.gmra.mxu0 %v60_v30 }
 0x107   :  { %v150_v35 = vpop.f32.mrf.mxu0 }
 0x108   :  { %v151_v36 = vadd.f32 %v266_v34, %v150_v35 }
 0x109   :  { %v336_v37 = vpop.f32.mrf.mxu0 }
 0x10a   :  { %v154_v38 = vmax.f32 %v151_v36, 0.0 }
 0x10c   :  { %370 = vmatmul.mubr.f32.vlgmr.msra.gmra.mxu1 %v154_v38 }
 0x1cc   :  { %v244_v40 = vpop.f32.mrf.mxu1 }
 0x1cd   :  { %v245_v41 = vadd.f32 %v267_v39, %v244_v40 }
 0x1ce   :  { %v371_v42 = vpop.f32.mrf.mxu1 }
 0x1cf   :  { %v248_v43 = vmax.f32 %v245_v41, 0.0 }
 0x1d1   :  { %249 = vst [vmem:[#allocation8] sm:$0xff] %v248_v43 }
 0x1d2   :  { %451 = shalt.err (!%p448_p5)
}
 0x1d3   :  { %259 = dma.vmem_to_hbm [thread:$0]  %s257_s12, 128, %s561_s5, [#allocation4]  }
 0x1d4   :  { %464 = dma.done.wait [#allocation4], 128  }
 0x1d5   :  { %465 = vsyncadd [#allocation4], 4294967168 }
 0x1d6   :  { %263 = vsyncpa [#allocation3], 1 }
 0x1d7   :  { %264 = vsyncpa [#allocation6], 1 }
 0x1d8   :  { %265 = vsyncpa [#allocation4], 1 }

// kernel: tpu_custom_call.1
= control target key start
LH: loop header
LB: loop body
LE: loop exit
PB: predicated region body
PF: predicated region fallthrough
CT: control target
= control target key end

     0   :  { %10 = vsyncpa [#allocation3], 0  ;;  %s556_s0 = inlined_call_operand.hbm [shape: f32[8,128], index: 0, kind: input, shape index: {}]   ;;  %s557_s1 = inlined_call_operand.hbm [shape: f32[128,128], index: 1, kind: input, shape index: {}]   ;;  %s558_s2 = inlined_call_operand.vmem [shape: f32[1,128], index: 2, kind: input, shape index: {}]   ;;  %s559_s3 = inlined_call_operand.hbm [shape: f32[128,128], index: 3, kind: input, shape index: {}]   ;;  %s560_s4 = inlined_call_operand.vmem [shape: f32[1,128], index: 4, kind: input, shape index: {}]   ;;  %s561_s5 = inlined_call_operand.hbm [shape: f32[8,128], index: 5, kind: output, shape index: {}]  }
   0x1   :  { %11 = vsyncpa [#allocation6], 0 }
   0x2   :  { %12 = vsyncpa [#allocation4], 0  ;;  %s466_s18 = smov [#allocation5]  }
   0x3   :  { %s28_s19 = sshll.u32 %s466_s18, 4  ;;  %s29_s19 = int_to_ptr.vmem [resolvable:$true] %s28_s19 }
   0x4   :  { %s388_s20 = scalar_lea.vmem %s29_s19, 2048  ;;  %p393_p1 = scmp.lt.s32.totalorder %s29_s19, %s29_s19 }
   0x5   :  { %p389_p0 = scmp.ne.s32.totalorder %s29_s19, %s388_s20  ;;  %p394_p2 = scmp.lt.s32.totalorder %s388_s20, %s388_s20 }
   0x7   :  { %p395_p3 = por %p394_p2, %p393_p1 }
   0x9   :  { %p396_p4 = pnand %p395_p3, %p389_p0 }
   0xb   :  { %399 = shalt.err (!%p396_p4)
}
   0xc   :  { %s467_s21 = smov 128   ;;  %s468_s22 = smov 8  }
   0xd   :  { %34 = dma.hbm_to_vmem [thread:$0]  %s557_s1, 2048, %s29_s19, [#allocation6], %s467_s21, %s467_s21, %s468_s22  }
   0xe   :  { %s469_s25 = smov [#allocation2]   ;;  %s470_s27 = smov [#allocation7]  }
   0xf   :  { %s19_s26 = sshll.u32 %s469_s25, 4  ;;  %s42_s28 = sshll.u32 %s470_s27, 4  ;;  %s20_s26 = int_to_ptr.vmem [resolvable:$true] %s19_s26  ;;  %s43_s28 = int_to_ptr.vmem [resolvable:$true] %s42_s28 }
  0x10   :  { %s408_s29 = scalar_lea.vmem %s20_s26, 128  ;;  %p413_p6 = scmp.lt.s32.totalorder %s20_s26, %s20_s26 }
  0x11   :  { %p409_p5 = scmp.ne.s32.totalorder %s20_s26, %s408_s29  ;;  %p414_p7 = scmp.lt.s32.totalorder %s408_s29, %s408_s29 }
  0x13   :  { %p415_p8 = por %p414_p7, %p413_p6 }
  0x15   :  { %p416_p9 = pnand %p415_p8, %p409_p5 }
  0x17   :  { %419 = shalt.err (!%p416_p9)
}
  0x18   :  { %22 = dma.hbm_to_vmem [thread:$0]  %s556_s0, 128, %s20_s26, [#allocation3]  }
  0x19   :  { %s428_s7 = scalar_lea.vmem %s43_s28, 2048  ;;  %p433_p11 = scmp.lt.s32.totalorder %s43_s28, %s43_s28 }
  0x1a   :  { %p429_p10 = scmp.ne.s32.totalorder %s43_s28, %s428_s7  ;;  %p434_p12 = scmp.lt.s32.totalorder %s428_s7, %s428_s7 }
  0x1c   :  { %p435_p13 = por %p434_p12, %p433_p11 }
  0x1e   :  { %p436_p0 = pnand %p435_p13, %p429_p10 }
  0x20   :  { %439 = shalt.err (!%p436_p0)
}
  0x21   :  { %48 = dma.hbm_to_vmem [thread:$0]  %s559_s3, 2048, %s43_s28, [#allocation6], %s467_s21, %s467_s21, %s468_s22  }
  0x22   :  { %460 = dma.done.wait [#allocation3], 128  }
  0x23   :  { %461 = vsyncadd [#allocation3], 4294967168 }
  0x24   :  { %462 = dma.done.wait [#allocation6], 4096  }
  0x25   :  { %463 = vsyncadd [#allocation6], 4294963200  ;;  %v471_v0 = vmov 0.0   ;;  %vm472_vm0 = vmmov 0   ;;  %v76_v1 = vld [vmem:[#allocation5 + $0x78] sm:$0xff]  ;;  %v75_v2 = vld [vmem:[#allocation5 + $0x70] sm:$0xff] }
  0x26   :  { %302 = vmatprep.subr.mxu0 %v471_v0  ;;  %334 = vmatprep.mubr.msk.f32.mxu0 %vm472_vm0, %v471_v0  ;;  %v74_v3 = vld [vmem:[#allocation5 + $0x68] sm:$0xff]  ;;  %v73_v4 = vld [vmem:[#allocation5 + $0x60] sm:$0xff]  ;;  %v170_v5 = vld [vmem:[#allocation7 + $0x78] sm:$0xff]  ;;  %s473_s11 = smov [#allocation8]  }
  0x27   :  { %337 = vmatprep.subr.mxu1 %v471_v0  ;;  %369 = vmatprep.mubr.msk.f32.mxu1 %vm472_vm0, %v471_v0  ;;  %v72_v6 = vld [vmem:[#allocation5 + $0x58] sm:$0xff]  ;;  %v169_v7 = vld [vmem:[#allocation7 + $0x70] sm:$0xff]  ;;  %v168_v8 = vld [vmem:[#allocation7 + $0x68] sm:$0xff]  ;;  %s256_s12 = sshll.u32 %s473_s11, 4  ;;  %s257_s12 = int_to_ptr.vmem [resolvable:$true] %s256_s12 }
  0x28   :  { %303 = vmatpush3.msra.mxu0 %v76_v1  ;;  %338 = vmatpush3.msra.mxu1 %v170_v5  ;;  %v71_v9 = vld [vmem:[#allocation5 + $0x50] sm:$0xff]  ;;  %v167_v10 = vld [vmem:[#allocation7 + $0x60] sm:$0xff]  ;;  %v70_v11 = vld [vmem:[#allocation5 + $0x48] sm:$0xff]  ;;  %s440_s13 = scalar_lea.vmem %s257_s12, 128  ;;  %p445_p2 = scmp.lt.s32.totalorder %s257_s12, %s257_s12 }
  0x29   :  { %304 = vmatprep.subr.mxu0 %v471_v0  ;;  %339 = vmatprep.subr.mxu1 %v471_v0  ;;  %v166_v12 = vld [vmem:[#allocation7 + $0x58] sm:$0xff]  ;;  %v69_v13 = vld [vmem:[#allocation5 + $0x40] sm:$0xff]  ;;  %v165_v14 = vld [vmem:[#allocation7 + $0x50] sm:$0xff]  ;;  %p441_p1 = scmp.ne.s32.totalorder %s257_s12, %s440_s13  ;;  %p446_p3 = scmp.lt.s32.totalorder %s440_s13, %s440_s13 }
  0x2a   :  { %305 = vmatpush3.msra.mxu0 %v75_v2  ;;  %340 = vmatpush3.msra.mxu1 %v169_v7  ;;  %v68_v15 = vld [vmem:[#allocation5 + $0x38] sm:$0xff]  ;;  %v164_v16 = vld [vmem:[#allocation7 + $0x48] sm:$0xff]  ;;  %v67_v17 = vld [vmem:[#allocation5 + $0x30] sm:$0xff] }
  0x2b   :  { %306 = vmatprep.subr.mxu0 %v471_v0  ;;  %341 = vmatprep.subr.mxu1 %v471_v0  ;;  %v163_v18 = vld [vmem:[#allocation7 + $0x40] sm:$0xff]  ;;  %v66_v19 = vld [vmem:[#allocation5 + $0x28] sm:$0xff]  ;;  %v162_v20 = vld [vmem:[#allocation7 + $0x38] sm:$0xff]  ;;  %p447_p4 = por %p446_p3, %p445_p2 }
  0x2c   :  { %307 = vmatpush3.msra.mxu0 %v74_v3  ;;  %342 = vmatpush3.msra.mxu1 %v168_v8  ;;  %v65_v21 = vld [vmem:[#allocation5 + $0x20] sm:$0xff]  ;;  %v161_v22 = vld [vmem:[#allocation7 + $0x30] sm:$0xff]  ;;  %v64_v23 = vld [vmem:[#allocation5 + $0x18] sm:$0xff] }
  0x2d   :  { %308 = vmatprep.subr.mxu0 %v471_v0  ;;  %343 = vmatprep.subr.mxu1 %v471_v0  ;;  %v160_v24 = vld [vmem:[#allocation7 + $0x28] sm:$0xff]  ;;  %v63_v25 = vld [vmem:[#allocation5 + $0x10] sm:$0xff]  ;;  %v159_v26 = vld [vmem:[#allocation7 + $0x20] sm:$0xff]  ;;  %p448_p5 = pnand %p447_p4, %p441_p1 }
  0x2e   :  { %309 = vmatpush3.msra.mxu0 %v73_v4  ;;  %344 = vmatpush3.msra.mxu1 %v167_v10  ;;  %v62_v27 = vld [vmem:[#allocation5 + $0x8] sm:$0xff]  ;;  %v158_v28 = vld [vmem:[#allocation7 + $0x18] sm:$0xff]  ;;  %v61_v29 = vld [vmem:[#allocation5] sm:$0xff] }
  0x2f   :  { %310 = vmatprep.subr.mxu0 %v471_v0  ;;  %345 = vmatprep.subr.mxu1 %v471_v0  ;;  %v60_v30 = vld [vmem:[#allocation2] sm:$0xff]  ;;  %v157_v31 = vld [vmem:[#allocation7 + $0x10] sm:$0xff]  ;;  %v156_v32 = vld [vmem:[#allocation7 + $0x8] sm:$0xff] }
  0x30   :  { %311 = vmatpush3.msra.mxu0 %v72_v6  ;;  %346 = vmatpush3.msra.mxu1 %v166_v12  ;;  %v155_v33 = vld [vmem:[#allocation7] sm:$0xff]  ;;  %v266_v34 = vld [vmem:[%s558_s2] ss:$0 sm:$0xff] }
  0x31   :  { %312 = vmatprep.subr.mxu0 %v471_v0  ;;  %347 = vmatprep.subr.mxu1 %v471_v0  ;;  %v267_v39 = vld [vmem:[%s560_s4] ss:$0 sm:$0xff] }
  0x32   :  { %313 = vmatpush3.msra.mxu0 %v71_v9  ;;  %348 = vmatpush3.msra.mxu1 %v165_v14 }
  0x33   :  { %314 = vmatprep.subr.mxu0 %v471_v0  ;;  %349 = vmatprep.subr.mxu1 %v471_v0 }
  0x34   :  { %315 = vmatpush3.msra.mxu0 %v70_v11  ;;  %350 = vmatpush3.msra.mxu1 %v164_v16 }
  0x35   :  { %316 = vmatprep.subr.mxu0 %v471_v0  ;;  %351 = vmatprep.subr.mxu1 %v471_v0 }
  0x36   :  { %317 = vmatpush3.msra.mxu0 %v69_v13  ;;  %352 = vmatpush3.msra.mxu1 %v163_v18 }
  0x37   :  { %318 = vmatprep.subr.mxu0 %v471_v0  ;;  %353 = vmatprep.subr.mxu1 %v471_v0 }
  0x38   :  { %319 = vmatpush3.msra.mxu0 %v68_v15  ;;  %354 = vmatpush3.msra.mxu1 %v162_v20 }
  0x39   :  { %320 = vmatprep.subr.mxu0 %v471_v0  ;;  %355 = vmatprep.subr.mxu1 %v471_v0 }
  0x3a   :  { %321 = vmatpush3.msra.mxu0 %v67_v17  ;;  %356 = vmatpush3.msra.mxu1 %v161_v22 }
  0x3b   :  { %322 = vmatprep.subr.mxu0 %v471_v0  ;;  %357 = vmatprep.subr.mxu1 %v471_v0 }
  0x3c   :  { %323 = vmatpush3.msra.mxu0 %v66_v19  ;;  %358 = vmatpush3.msra.mxu1 %v160_v24 }
  0x3d   :  { %324 = vmatprep.subr.mxu0 %v471_v0  ;;  %359 = vmatprep.subr.mxu1 %v471_v0 }
  0x3e   :  { %325 = vmatpush3.msra.mxu0 %v65_v21  ;;  %360 = vmatpush3.msra.mxu1 %v159_v26 }
  0x3f   :  { %326 = vmatprep.subr.mxu0 %v471_v0  ;;  %361 = vmatprep.subr.mxu1 %v471_v0 }
  0x40   :  { %327 = vmatpush3.msra.mxu0 %v64_v23  ;;  %362 = vmatpush3.msra.mxu1 %v158_v28 }
  0x41   :  { %328 = vmatprep.subr.mxu0 %v471_v0  ;;  %363 = vmatprep.subr.mxu1 %v471_v0 }
  0x42   :  { %329 = vmatpush3.msra.mxu0 %v63_v25  ;;  %364 = vmatpush3.msra.mxu1 %v157_v31 }
  0x43   :  { %330 = vmatprep.subr.mxu0 %v471_v0  ;;  %365 = vmatprep.subr.mxu1 %v471_v0 }
  0x44   :  { %331 = vmatpush3.msra.mxu0 %v62_v27  ;;  %366 = vmatpush3.msra.mxu1 %v156_v32 }
  0x45   :  { %332 = vmatprep.subr.mxu0 %v471_v0  ;;  %367 = vmatprep.subr.mxu1 %v471_v0 }
  0x46   :  { %333 = vmatpush3.msra.mxu0 %v61_v29  ;;  %368 = vmatpush3.msra.mxu1 %v155_v33 }
  0x47   :  { %335 = vmatmul.mubr.f32.vlgmr.msra.gmra.mxu0 %v60_v30 }
 0x107   :  { %v150_v35 = vpop.f32.mrf.mxu0 }
 0x108   :  { %v151_v36 = vadd.f32 %v266_v34, %v150_v35 }
 0x109   :  { %v336_v37 = vpop.f32.mrf.mxu0 }
 0x10a   :  { %v154_v38 = vmax.f32 %v151_v36, 0.0 }
 0x10c   :  { %370 = vmatmul.mubr.f32.vlgmr.msra.gmra.mxu1 %v154_v38 }
 0x1cc   :  { %v244_v40 = vpop.f32.mrf.mxu1 }
 0x1cd   :  { %v245_v41 = vadd.f32 %v267_v39, %v244_v40 }
 0x1ce   :  { %v371_v42 = vpop.f32.mrf.mxu1 }
 0x1cf   :  { %v248_v43 = vmax.f32 %v245_v41, 0.0 }
 0x1d1   :  { %249 = vst [vmem:[#allocation8] sm:$0xff] %v248_v43 }
 0x1d2   :  { %451 = shalt.err (!%p448_p5)
}
 0x1d3   :  { %259 = dma.vmem_to_hbm [thread:$0]  %s257_s12, 128, %s561_s5, [#allocation4]  }
 0x1d4   :  { %464 = dma.done.wait [#allocation4], 128  }
 0x1d5   :  { %465 = vsyncadd [#allocation4], 4294967168 }
 0x1d6   :  { %263 = vsyncpa [#allocation3], 1 }
 0x1d7   :  { %264 = vsyncpa [#allocation6], 1 }
 0x1d8   :  { %265 = vsyncpa [#allocation4], 1 }

</bundles_post_ra>
